<compile_context>
chip_gen: v7x
topology: tpu7x:2x2x1
jax: 0.10.0
libtpu: 0.0.40
codegen_flags: <defaults>
</compile_context>

<pallas_src>
import functools

import jax
import jax.numpy as jnp
from jax import lax
from jax.experimental import pallas as pl
from jax.experimental.pallas import tpu as pltpu

LANES = 128
TARGET_STEP_BYTES = 4 << 20      # HBM bytes per grid step (both inputs combined)
MAX_TILE_ROWS = 8192             # absolute cap on rows per block
MIN_TILES_FOR_ODD_SPLIT = 16     # accept one masked duplicate block only if cheap
VMEM_LIMIT_BYTES = 32 * 1024 * 1024


def _focal_loss_kernel(pred_ref, true_ref, out_ref, acc_ref, *,
                       alpha, gamma, tile_rows, steps_per_chunk, rows_total,
                       acc_rows, has_ragged, binary_targets):
    c = pl.program_id(0)   # chunk (parallel axis; one per TensorCore on v7x)
    i = pl.program_id(1)   # sequential step within the chunk

    @pl.when(i == 0)
    def _():
        acc_ref[...] = jnp.zeros_like(acc_ref)

    x = pred_ref[...].astype(jnp.float32)   # logits
    y = true_ref[...].astype(jnp.float32)   # targets

    # binary_cross_entropy_with_logits (no reduction), numerically stable:
    #   bce = max(x, 0) - x*y + log1p(exp(-|x|))
    t = jnp.exp(-jnp.abs(x))                                   # EUP exp
    bce = jnp.maximum(x, 0.0) - x * y + jnp.log1p(t)           # EUP log1p

    if binary_targets:
        # pt = exp(-bce) = exp(x*y - max(x,0)) / (1 + t).  For hard 0/1 labels
        # the numerator is 1 or t (a VPU select) -> saves one EUP exp/element.
        disagree = jnp.logical_xor(x >= 0.0, y >= 0.5)
        num = jnp.where(disagree, t, 1.0)
        d = 1.0 + t
        r = pl.reciprocal(d, approx=True)
        r = r * (2.0 - d * r)                                  # one Newton step
        pt = num * r
    else:
        pt = jnp.exp(-bce)                                     # EUP exp

    one_minus_pt = 1.0 - pt

    g = float(gamma)
    if g == 0.0:
        fl = bce
    elif g.is_integer() and 0.0 < g <= 32.0:
        # Square-and-multiply chain starting from one_minus_pt (no ones
        # broadcast; gamma=2 -> a single VPU multiply).
        n = int(g)
        mod = None
        base = one_minus_pt
        while True:
            if n & 1:
                mod = base if mod is None else mod * base
            n >>= 1
            if not n:
                break
            base = base * base
        fl = mod * bce
    else:
        # Non-integer gamma: clamp to avoid NaN if bce is slightly negative.
        fl = jnp.power(jnp.maximum(one_minus_pt, 0.0), g) * bce
    if float(alpha) != 1.0:
        fl = float(alpha) * fl

    def accumulate(v):
        if acc_rows == 8:
            # Sum only over the vreg-stacking axis: pure VPU adds, no XLU.
            acc_ref[...] += v.reshape(tile_rows // 8, 8, LANES).sum(axis=0)
        else:
            acc_ref[...] += v.sum(axis=0, keepdims=True)

    if has_ragged:
        # Only boundary / duplicate blocks pay for the mask; interior blocks
        # take the unmasked branch.  rows_here uses row counts (no int32
        # overflow even for multi-GiB inputs).
        rows_here = rows_total - (c * steps_per_chunk + i) * tile_rows

        @pl.when(rows_here >= tile_rows)
        def _():
            accumulate(fl)

        @pl.when(rows_here < tile_rows)
        def _():
            row_ids = lax.broadcasted_iota(jnp.int32, (tile_rows, LANES), 0)
            accumulate(jnp.where(row_ids < rows_here, fl, 0.0))
    else:
        accumulate(fl)

    @pl.when(i == pl.num_programs(1) - 1)
    def _():
        out_ref[...] = acc_ref[...].reshape(out_ref.shape)


def _focal_elementwise(x, y, alpha, gamma):
    """Plain-jnp focal loss per element (used for the <128-element tail)."""
    x = x.astype(jnp.float32)
    y = y.astype(jnp.float32)
    bce = jnp.maximum(x, 0.0) - x * y + jnp.log1p(jnp.exp(-jnp.abs(x)))
    pt = jnp.exp(-bce)
    return alpha * (1.0 - pt) ** gamma * bce


def focal_loss(y_pred, y_true, alpha=1.0, gamma=2.0, binary_targets=False):
    """Focal loss with logits, mean-reduced (from_logits=True, reduce=True).

    binary_targets=True enables a hard-0/1-label fast path (one fewer EUP exp
    per element); leave False for soft labels.
    """
    assert y_pred.shape == y_true.shape
    total = int(y_pred.size)
    alpha = float(alpha)
    gamma = float(gamma)

    pred_flat = y_pred.reshape(-1)
    true_flat = y_true.reshape(-1)

    rows = total // LANES
    tail = total - rows * LANES

    if rows == 0:
        # Tiny input: no kernel needed.
        return jnp.sum(_focal_elementwise(pred_flat, true_flat, alpha, gamma)) / jnp.float32(total)

    tail_sum = jnp.float32(0.0)
    if tail:
        # Fold the <128-element tail in with plain jnp (reads only the tail);
        # the kernel runs over the 128-aligned prefix — no full-array jnp.pad.
        tail_sum = jnp.sum(_focal_elementwise(
            lax.slice_in_dim(pred_flat, rows * LANES, total),
            lax.slice_in_dim(true_flat, rows * LANES, total), alpha, gamma))
        pred_flat = lax.slice_in_dim(pred_flat, 0, rows * LANES)
        true_flat = lax.slice_in_dim(true_flat, 0, rows * LANES)

    pred2d = pred_flat.reshape(rows, LANES)
    true2d = true_flat.reshape(rows, LANES)

    # --- Tile sizing: ~TARGET_STEP_BYTES of HBM per grid step, scaled by dtype
    # so bf16 inputs keep the same bytes/step.  Multiple of 8 rows when tiled.
    bytes_per_row = LANES * (y_pred.dtype.itemsize + y_true.dtype.itemsize)
    max_rows = max(8, min(MAX_TILE_ROWS, (TARGET_STEP_BYTES // bytes_per_row) // 8 * 8))
    if rows <= max_rows:
        tile_rows = rows               # single block == full array dim (any row count OK)
        tiles = 1
    else:
        tile_rows = max_rows
        tiles = -(-rows // tile_rows)

    # --- Chunk split for v7x's two TensorCores.  Split only when clean (even
    # #tiles) or when the single fully-masked duplicate block is cheap.
    if tiles >= 2 and (tiles % 2 == 0 or tiles >= MIN_TILES_FOR_ODD_SPLIT):
        num_chunks = 2
    else:
        num_chunks = 1
    steps_per_chunk = -(-tiles // num_chunks)

    # Mask is only compiled in if a partial or duplicate block can exist.
    has_ragged = (num_chunks * steps_per_chunk * tile_rows) != rows
    acc_rows = 8 if tile_rows % 8 == 0 else 1

    def in_map(c, i):
        # Clamp so boundary/duplicate DMAs stay in bounds; any duplicate block
        # is fully masked out in the kernel (rows_here <= 0).
        return (jnp.minimum(c * steps_per_chunk + i, tiles - 1), 0)

    in_spec = pl.BlockSpec((tile_rows, LANES), in_map)
    out_spec = pl.BlockSpec((1, acc_rows, LANES), lambda c, i: (c, 0, 0))

    kernel = functools.partial(
        _focal_loss_kernel, alpha=alpha, gamma=gamma, tile_rows=tile_rows,
        steps_per_chunk=steps_per_chunk, rows_total=rows, acc_rows=acc_rows,
        has_ragged=has_ragged, binary_targets=bool(binary_targets))

    partials = pl.pallas_call(
        kernel,
        out_shape=jax.ShapeDtypeStruct((num_chunks, acc_rows, LANES), jnp.float32),
        grid_spec=pltpu.PrefetchScalarGridSpec(
            num_scalar_prefetch=0,
            grid=(num_chunks, steps_per_chunk),
            in_specs=[in_spec, in_spec],
            out_specs=out_spec,
            scratch_shapes=[pltpu.VMEM((acc_rows, LANES), jnp.float32)],
        ),
        compiler_params=pltpu.CompilerParams(
            # TODO(synk): on v7x, verify with xprof that both TensorCores stream;
            # if not, switch the chunk axis to pltpu.CORE_PARALLEL.
            dimension_semantics=("parallel", "arbitrary"),
            vmem_limit_bytes=VMEM_LIMIT_BYTES),
    )(pred2d, true2d)

    # Final cross-sublane / cross-lane / cross-chunk reduce + mean, done once.
    return (jnp.sum(partials) + tail_sum) / jnp.float32(total)


def focal_loss_ref(y_pred, y_true, alpha=1.0, gamma=2.0):
    x = y_pred.astype(jnp.float32)
    y = y_true.astype(jnp.float32)
    bce = jnp.maximum(x, 0.0) - x * y + jnp.log1p(jnp.exp(-jnp.abs(x)))
    pt = jnp.exp(-bce)
    fl = alpha * (1.0 - pt) ** gamma * bce
    return jnp.mean(fl)


if __name__ == "__main__":
    key = jax.random.PRNGKey(0)

    # (shape, dtype, alpha, gamma, binary_targets)
    cases = [
        ((2, 4, 16, 16), jnp.float32, 1.0, 2.0, False),    # base NCHW case, single block
        ((2, 3, 17, 19), jnp.float32, 0.25, 2.0, False),   # ragged size -> wrapper tail, no pad
        ((16, 8, 96, 80), jnp.float32, 1.0, 3.0, False),   # 2 chunks, masked boundary block
        ((2, 4, 16, 16), jnp.bfloat16, 1.0, 2.0, False),   # in-kernel upcast from bf16
        ((2, 4, 16, 16), jnp.float32, 1.0, 2.0, True),     # hard-label fast path (1 fewer exp)
    ]

    k = key
    for shape, dtype, alpha, gamma, binary in cases:
        k, k1, k2 = jax.random.split(k, 3)
        y_pred = (jax.random.normal(k1, shape, dtype=jnp.float32) * 2.0).astype(dtype)
        y_true = (jax.random.uniform(k2, shape) > 0.5).astype(dtype)

        loss = jax.block_until_ready(
            focal_loss(y_pred, y_true, alpha=alpha, gamma=gamma, binary_targets=binary))
        ref = focal_loss_ref(y_pred, y_true, alpha=alpha, gamma=gamma)
        assert jnp.allclose(loss, ref, rtol=1e-4, atol=1e-6), \
            (shape, dtype, binary, float(loss), float(ref))

    # TODO(synk): only the default forward path (from_logits=True, reduce=True) is
    # implemented; the elementwise (reduce=False) and probability-input branches are
    # configuration variants not exercised by the default module.
    print("KERNEL_OK")
</pallas_src>

<mosaic_0001>
module attributes {stable_mosaic.version = 11 : i64} {
  func.func @_focal_loss_kernel(%arg0: i32, %arg1: i32, %arg2: memref<16x128xf32, #tpu.memory_space<vmem>>, %arg3: memref<16x128xf32, #tpu.memory_space<vmem>>, %arg4: memref<1x8x128xf32, #tpu.memory_space<vmem>>, %arg5: memref<8x128xf32, #tpu.memory_space<vmem>>) attributes {dimension_semantics = [#tpu.dimension_semantics<parallel>, #tpu.dimension_semantics<arbitrary>], iteration_bounds = array<i64: 1, 1>, scalar_prefetch = 0 : i64, scratch_operands = 1 : i64, tpu.core_type = #tpu.core_type<tc>, window_params = [{transform_indices = @transform_0, window_bounds = array<i64: 16, 128>}, {transform_indices = @transform_1, window_bounds = array<i64: 16, 128>}, {transform_indices = @transform_2, window_bounds = array<i64: 1, 8, 128>}]} {
    %c0_i32 = arith.constant 0 : i32
    %0 = arith.cmpi eq, %arg1, %c0_i32 : i32
    %1 = arith.extui %0 : i1 to i32
    %c0_i32_0 = arith.constant 0 : i32
    %2 = arith.cmpi ne, %1, %c0_i32_0 : i32
    scf.if %2 {
      %cst_14 = arith.constant 0.000000e+00 : f32
      %30 = vector.broadcast %cst_14 : f32 to vector<8x128xf32>
      %c0_15 = arith.constant 0 : index
      %c0_16 = arith.constant 0 : index
      %31 = vector.load %arg5[%c0_15, %c0_16] : memref<8x128xf32, #tpu.memory_space<vmem>>, vector<8x128xf32>
      tpu.vector_store %arg5[%c0_15, %c0_16], %30 {strides = array<i32>} : memref<8x128xf32, #tpu.memory_space<vmem>>, vector<8x128xf32>,
    } else {
    }
    %c0 = arith.constant 0 : index
    %c0_1 = arith.constant 0 : index
    %3 = vector.load %arg2[%c0, %c0_1] : memref<16x128xf32, #tpu.memory_space<vmem>>, vector<16x128xf32>
    %c0_2 = arith.constant 0 : index
    %c0_3 = arith.constant 0 : index
    %4 = vector.load %arg3[%c0_2, %c0_3] : memref<16x128xf32, #tpu.memory_space<vmem>>, vector<16x128xf32>
    %5 = math.absf %3 : vector<16x128xf32>
    %cst = arith.constant 0.000000e+00 : f32
    %6 = vector.broadcast %cst : f32 to vector<16x128xf32>
    %7 = arith.subf %6, %5 : vector<16x128xf32>
    %8 = math.exp %7 : vector<16x128xf32>
    %cst_4 = arith.constant 0.000000e+00 : f32
    %9 = vector.broadcast %cst_4 : f32 to vector<16x128xf32>
    %10 = arith.maximumf %3, %9 : vector<16x128xf32>
    %11 = arith.mulf %3, %4 : vector<16x128xf32>
    %12 = arith.subf %10, %11 : vector<16x128xf32>
    %13 = math.log1p %8 : vector<16x128xf32>
    %14 = arith.addf %12, %13 : vector<16x128xf32>
    %cst_5 = arith.constant 0.000000e+00 : f32
    %15 = vector.broadcast %cst_5 : f32 to vector<16x128xf32>
    %16 = arith.subf %15, %14 : vector<16x128xf32>
    %17 = math.exp %16 : vector<16x128xf32>
    %cst_6 = arith.constant 1.000000e+00 : f32
    %18 = vector.broadcast %cst_6 : f32 to vector<16x128xf32>
    %19 = arith.subf %18, %17 : vector<16x128xf32>
    %20 = arith.mulf %19, %19 : vector<16x128xf32>
    %21 = arith.mulf %20, %14 : vector<16x128xf32>
    %c0_7 = arith.constant 0 : index
    %c0_8 = arith.constant 0 : index
    %22 = vector.load %arg5[%c0_7, %c0_8] : memref<8x128xf32, #tpu.memory_space<vmem>>, vector<8x128xf32>
    %23 = vector.shape_cast %21 : vector<16x128xf32> to vector<2x8x128xf32>
    %cst_9 = arith.constant dense<0.000000e+00> : vector<8x128xf32>
    %24 = vector.multi_reduction <add>, %23, %cst_9 [0] : vector<2x8x128xf32> to vector<8x128xf32>
    %25 = arith.addf %22, %24 : vector<8x128xf32>
    %c0_10 = arith.constant 0 : index
    %c0_11 = arith.constant 0 : index
    %26 = vector.load %arg5[%c0_10, %c0_11] : memref<8x128xf32, #tpu.memory_space<vmem>>, vector<8x128xf32>
    tpu.vector_store %arg5[%c0_10, %c0_11], %25 {strides = array<i32>} : memref<8x128xf32, #tpu.memory_space<vmem>>, vector<8x128xf32>,
    %c0_i32_12 = arith.constant 0 : i32
    %27 = arith.cmpi eq, %arg1, %c0_i32_12 : i32
    %28 = arith.extui %27 : i1 to i32
    %c0_i32_13 = arith.constant 0 : i32
    %29 = arith.cmpi ne, %28, %c0_i32_13 : i32
    scf.if %29 {
      %c0_14 = arith.constant 0 : index
      %c0_15 = arith.constant 0 : index
      %30 = vector.load %arg5[%c0_14, %c0_15] : memref<8x128xf32, #tpu.memory_space<vmem>>, vector<8x128xf32>
      %31 = vector.shape_cast %30 : vector<8x128xf32> to vector<1x8x128xf32>
      %c0_16 = arith.constant 0 : index
      %c0_17 = arith.constant 0 : index
      %c0_18 = arith.constant 0 : index
      %32 = vector.load %arg4[%c0_16, %c0_17, %c0_18] : memref<1x8x128xf32, #tpu.memory_space<vmem>>, vector<1x8x128xf32>
      tpu.vector_store %arg4[%c0_16, %c0_17, %c0_18], %31 {strides = array<i32>} : memref<1x8x128xf32, #tpu.memory_space<vmem>>, vector<1x8x128xf32>,
    } else {
    }
    return
  }
  func.func @transform_0(%arg0: i32, %arg1: i32) -> (i32, i32) {
    %c1_i32 = arith.constant 1 : i32
    %0 = arith.muli %arg0, %c1_i32 : i32
    %1 = arith.addi %0, %arg1 : i32
    %c0_i32 = arith.constant 0 : i32
    %2 = arith.minsi %1, %c0_i32 : i32
    %c0_i32_0 = arith.constant 0 : i32
    %c0_i32_1 = arith.constant 0 : i32
    return %2, %c0_i32_0 : i32, i32
  }
  func.func @transform_1(%arg0: i32, %arg1: i32) -> (i32, i32) {
    %c1_i32 = arith.constant 1 : i32
    %0 = arith.muli %arg0, %c1_i32 : i32
    %1 = arith.addi %0, %arg1 : i32
    %c0_i32 = arith.constant 0 : i32
    %2 = arith.minsi %1, %c0_i32 : i32
    %c0_i32_0 = arith.constant 0 : i32
    %c0_i32_1 = arith.constant 0 : i32
    return %2, %c0_i32_0 : i32, i32
  }
  func.func @transform_2(%arg0: i32, %arg1: i32) -> (i32, i32, i32) {
    %c0_i32 = arith.constant 0 : i32
    %c0_i32_0 = arith.constant 0 : i32
    %c0_i32_1 = arith.constant 0 : i32
    return %arg0, %c0_i32, %c0_i32_0 : i32, i32, i32
  }
}

</mosaic_0001>

<bundles_post_ra>
// kernel: tpu_custom_call.1
= control target key start
LH: loop header
LB: loop body
LE: loop exit
PB: predicated region body
PF: predicated region fallthrough
CT: control target
= control target key end

     0   :  { %7 = vsyncpa [#allocation4], 0  ;;  %s289_s0 = inlined_call_operand.hbm [shape: f32[16,128], index: 0, kind: input, shape index: {}]   ;;  %s290_s1 = inlined_call_operand.hbm [shape: f32[16,128], index: 1, kind: input, shape index: {}]   ;;  %s291_s2 = inlined_call_operand.hbm [shape: f32[1,8,128], index: 2, kind: output, shape index: {}]  }
   0x1   :  { %8 = vsyncpa [#allocation7], 0 }
   0x2   :  { %9 = vsyncpa [#allocation5], 0  ;;  %s233_s9 = smov [#allocation3]   ;;  %s161_s13 = scalar_lea.hbm %s289_s0, 256 }
   0x3   :  { %s21_s10 = sshll.u32 %s233_s9, 4  ;;  %p162_p0 = scmp.ne.s32.totalorder %s289_s0, %s161_s13  ;;  %s22_s10 = int_to_ptr.vmem [resolvable:$true] %s21_s10 }
   0x4   :  { %p165_p1 = scmp.lt.u32.totalorder %s161_s13, %s289_s0 }
   0x6   :  { %p167_p2 = pnand %p165_p1, %p162_p0 }
   0x8   :  { %170 = shalt.err (!%p167_p2)
}
   0x9   :  { %s171_s18 = scalar_lea.vmem %s22_s10, 256  ;;  %p176_p4 = scmp.lt.s32.totalorder %s22_s10, %s22_s10 }
   0xa   :  { %p172_p3 = scmp.ne.s32.totalorder %s22_s10, %s171_s18  ;;  %p177_p5 = scmp.lt.s32.totalorder %s171_s18, %s171_s18 }
   0xc   :  { %p178_p6 = por %p177_p5, %p176_p4 }
   0xe   :  { %p179_p7 = pnand %p178_p6, %p172_p3 }
  0x10   :  { %182 = shalt.err (!%p179_p7)
}
  0x11   :  { %s234_s19 = smov 128   ;;  %s235_s20 = smov 8  }
  0x12   :  { %27 = dma.hbm_to_vmem [thread:$0]  %s289_s0, 256, %s22_s10, [#allocation4], %s234_s19, %s234_s19, %s235_s20  }
  0x13   :  { %s236_s23 = smov [#allocation6]   ;;  %s183_s27 = scalar_lea.hbm %s290_s1, 256 }
  0x14   :  { %s39_s24 = sshll.u32 %s236_s23, 4  ;;  %p184_p8 = scmp.ne.s32.totalorder %s290_s1, %s183_s27  ;;  %s40_s24 = int_to_ptr.vmem [resolvable:$true] %s39_s24 }
  0x15   :  { %p187_p9 = scmp.lt.u32.totalorder %s183_s27, %s290_s1 }
  0x17   :  { %p189_p10 = pnand %p187_p9, %p184_p8 }
  0x19   :  { %192 = shalt.err (!%p189_p10)
}
  0x1a   :  { %s193_s4 = scalar_lea.vmem %s40_s24, 256  ;;  %p198_p12 = scmp.lt.s32.totalorder %s40_s24, %s40_s24 }
  0x1b   :  { %p194_p11 = scmp.ne.s32.totalorder %s40_s24, %s193_s4  ;;  %p199_p13 = scmp.lt.s32.totalorder %s193_s4, %s193_s4 }
  0x1d   :  { %p200_p0 = por %p199_p13, %p198_p12 }
  0x1f   :  { %p201_p1 = pnand %p200_p0, %p194_p11 }
  0x21   :  { %204 = shalt.err (!%p201_p1)
}
  0x22   :  { %45 = dma.hbm_to_vmem [thread:$0]  %s290_s1, 256, %s40_s24, [#allocation7], %s234_s19, %s234_s19, %s235_s20  }
  0x23   :  { %227 = dma.done.wait [#allocation4], 256  }
  0x24   :  { %228 = vsyncadd [#allocation4], 4294967040 }
  0x25   :  { %229 = dma.done.wait [#allocation7], 256  }
  0x26   :  { %230 = vsyncadd [#allocation7], 4294967040  ;;  %v65_v0 = vld [vmem:[#allocation3] sm:$0xff]  ;;  %v66_v1 = vld [vmem:[#allocation3 + $0x8] sm:$0xff]  ;;  %s237_s1 = smov [#allocation8]  }
  0x27   :  { %v69_v2 = vand.u32 2147483647, %v65_v0  ;;  %v70_v3 = vand.u32 2147483647, %v66_v1  ;;  %v67_v14 = vld [vmem:[#allocation6] sm:$0xff]  ;;  %v68_v15 = vld [vmem:[#allocation6 + $0x8] sm:$0xff] }
  0x28   :  { %v77_v17 = vmax.f32 %v65_v0, 0.0  ;;  %v79_v18 = vmul.f32 %v67_v14, %v65_v0  ;;  %v78_v21 = vmax.f32 %v66_v1, 0.0  ;;  %v80_v22 = vmul.f32 %v68_v15, %v66_v1  ;;  %s130_s6 = sshll.u32 %s237_s1, 4  ;;  %s131_s6 = int_to_ptr.vmem [resolvable:$true] %s130_s6 }
  0x29   :  { %v71_v4 = vsub.f32 0.0, %v69_v2  ;;  %v72_v5 = vsub.f32 0.0, %v70_v3  ;;  %s205_s7 = scalar_lea.vmem %s131_s6, 128  ;;  %p210_p3 = scmp.lt.s32.totalorder %s131_s6, %s131_s6 }
  0x2a   :  { %v81_v26 = vsub.f32 %v77_v17, %v79_v18  ;;  %v82_v29 = vsub.f32 %v78_v21, %v80_v22  ;;  %p206_p2 = scmp.ne.s32.totalorder %s131_s6, %s205_s7  ;;  %p211_p4 = scmp.lt.s32.totalorder %s205_s7, %s205_s7 }
  0x2b   :  { %v73_v6 = vmul.f32 1.442695, %v71_v4  ;;  %v75_v7 = vmul.f32 1.442695, %v72_v5 }
  0x2c   :  { %p212_p5 = por %p211_p4, %p210_p3 }
  0x2d   :  { %149 = vpow2.f32 %v73_v6 }
  0x2e   :  { %151 = vpow2.f32 %v75_v7  ;;  %p213_p6 = pnand %p212_p5, %p206_p2 }
  0x37   :  { %v150_v8 = vpop.eup %149 }
  0x38   :  { %v152_v9 = vpop.eup %151  ;;  %v83_v10 = vadd.f32 1.0, %v150_v8  ;;  %v86_v12 = vmul.f32 -0.5, %v150_v8  ;;  %v89_v19 = vand.u32 2147483647, %v150_v8 }
  0x39   :  { %v92_v11 = vadd.f32 1.0, %v152_v9  ;;  %v95_v13 = vmul.f32 -0.5, %v152_v9  ;;  %v98_v23 = vand.u32 2147483647, %v152_v9 }
  0x3a   :  { %153 = vlog2.f32 %v83_v10  ;;  %v87_v16 = vadd.f32 1.0, %v86_v12  ;;  %vm90_vm0 = vcmp.lt.f32.partialorder %v89_v19, 0.0004427343 }
  0x3b   :  { %155 = vlog2.f32 %v92_v11  ;;  %v96_v20 = vadd.f32 1.0, %v95_v13  ;;  %vm99_vm1 = vcmp.lt.f32.partialorder %v98_v23, 0.0004427343 }
  0x3c   :  { %v88_v24 = vmul.f32 %v150_v8, %v87_v16 }
  0x3d   :  { %v97_v27 = vmul.f32 %v152_v9, %v96_v20 }
  0x44   :  { %v154_v25 = vpop.eup %153 }
  0x45   :  { %v156_v28 = vpop.eup %155  ;;  %v85_v30 = vmul.f32 0.6931472, %v154_v25 }
  0x46   :  { %v94_v31 = vmul.f32 0.6931472, %v156_v28 }
  0x47   :  { %v91_v32 = vsel %vm90_vm0, %v88_v24, %v85_v30 }
  0x48   :  { %v100_v33 = vsel %vm99_vm1, %v97_v27, %v94_v31  ;;  %v101_v34 = vadd.f32 %v91_v32, %v81_v26 }
  0x49   :  { %v102_v35 = vadd.f32 %v100_v33, %v82_v29 }
  0x4a   :  { %v103_v36 = vsub.f32 0.0, %v101_v34 }
  0x4b   :  { %v104_v37 = vsub.f32 0.0, %v102_v35 }
  0x4c   :  { %v105_v38 = vmul.f32 1.442695, %v103_v36 }
  0x4d   :  { %v107_v39 = vmul.f32 1.442695, %v104_v37 }
  0x4e   :  { %157 = vpow2.f32 %v105_v38 }
  0x4f   :  { %159 = vpow2.f32 %v107_v39 }
  0x58   :  { %v158_v40 = vpop.eup %157 }
  0x59   :  { %v160_v41 = vpop.eup %159  ;;  %v109_v42 = vsub.f32 1.0, %v158_v40 }
  0x5a   :  { %v110_v43 = vsub.f32 1.0, %v160_v41 }
  0x5b   :  { %v111_v44 = vmul.f32 %v109_v42, %v109_v42 }
  0x5c   :  { %v112_v45 = vmul.f32 %v110_v43, %v110_v43 }
  0x5d   :  { %v113_v46 = vmul.f32 %v111_v44, %v101_v34 }
  0x5e   :  { %v114_v47 = vmul.f32 %v112_v45, %v102_v35 }
  0x60   :  { %v116_v48 = vadd.f32 %v114_v47, %v113_v46 }
  0x62   :  { %123 = vst [vmem:[#allocation8] sm:$0xff] %v116_v48 }
  0x63   :  { %216 = shalt.err (!%p213_p6)
}
  0x64   :  { %s217_s10 = scalar_lea.hbm %s291_s2, 128 }
  0x65   :  { %p218_p7 = scmp.ne.s32.totalorder %s291_s2, %s217_s10  ;;  %p221_p8 = scmp.lt.u32.totalorder %s217_s10, %s291_s2 }
  0x67   :  { %p223_p9 = pnand %p221_p8, %p218_p7 }
  0x69   :  { %226 = shalt.err (!%p223_p9)
}
  0x6a   :  { %133 = dma.vmem_to_hbm [thread:$0]  %s131_s6, 128, %s291_s2, [#allocation5]  }
  0x6b   :  { %231 = dma.done.wait [#allocation5], 128  }
  0x6c   :  { %232 = vsyncadd [#allocation5], 4294967168 }
  0x6d   :  { %137 = vsyncpa [#allocation4], 1 }
  0x6e   :  { %138 = vsyncpa [#allocation7], 1 }
  0x6f   :  { %139 = vsyncpa [#allocation5], 1 }

</bundles_post_ra>
